<compile_context>
chip_gen: v7x
topology: tpu7x:2x2x1
jax: 0.10.0
libtpu: 0.0.40
codegen_flags: <defaults>
</compile_context>

<pallas_src>
import math

import jax
import jax.numpy as jnp
from jax import lax
from jax.experimental import pallas as pl
from jax.experimental.pallas import tpu as pltpu


def _rpe_kernel(q_ref, k_ref, bias_ref, o_ref):
    """One grid step over a (bb, hb, sq, sk) slab of attention scores.

    q_ref   : (bb, hb, sq, D)   VMEM
    k_ref   : (bb, hb, D, sk)   VMEM  (S on the lane dim -> no D lane-padding)
    bias_ref: (hb, sq, sk)      VMEM  (shared by every batch element in block)
    o_ref   : (bb, hb, sq, sk)  VMEM
    """
    bb, hb, sq, d = q_ref.shape
    sk = k_ref.shape[3]
    # Fuse (bb, hb) into one batch dim and do a single batched MXU matmul in
    # the native NN form: (g, sq, D) x (g, D, sk) -> (g, sq, sk).
    q = q_ref[...].reshape(bb * hb, sq, d)
    k = k_ref[...].reshape(bb * hb, d, sk)
    scores = lax.dot_general(
        q, k,
        dimension_numbers=(((2,), (1,)), ((0,), (0,))),
        preferred_element_type=jnp.float32,
    ).reshape(bb, hb, sq, sk)
    o_ref[...] = (scores + bias_ref[...][None]).astype(o_ref.dtype)


def _vmem_limit_bytes():
    """Generation-aware scoped-VMEM limit: ~3/4 of physical, capped at 96 MiB.
    -> 96 MiB on v5e/v6e (128 MiB physical), 48 MiB on v7x (64 MiB physical)."""
    cap = 64 * 1024 * 1024  # conservative fallback (v7x-sized)
    try:
        cap = int(getattr(pltpu.get_tpu_info(), "vmem_capacity_bytes", cap)) or cap
    except Exception:
        pass
    return min(96 * 1024 * 1024, (3 * cap) // 4)


def _choose_tiles(B, H, S, D, budget_bytes):
    """Pick (s_pad, sq, sk, hb, bb).

    Footprint model (f32): every in/out block double-buffered, last dim padded
    to 128 lanes and second-to-last to 8 sublanes, plus one output-sized
    temporary for the pre-bias scores.
    """
    pad8 = lambda v: -(-v // 8) * 8
    pad128 = lambda v: -(-v // 128) * 128

    def fits(bb, hb, sq, sk):
        q = bb * hb * pad8(sq) * pad128(D)      # (bb, hb, sq, D) block
        k = bb * hb * pad8(D) * pad128(sk)      # (bb, hb, D, sk) block
        bias = hb * pad8(sq) * pad128(sk)       # (hb, sq, sk)    block
        out = bb * hb * pad8(sq) * pad128(sk)   # (bb, hb, sq, sk) block
        return 4 * (2 * (q + k + bias + out) + out) <= budget_bytes

    if fits(1, 1, S, S):
        # Whole-S blocks: no padding, no S tiling (full-dim blocks are exempt
        # from the (8, 128) divisibility rule).
        s_pad, sq, sk = S, S, S
    else:
        # Tile S: pad to a multiple of 128 so every store is lane-dense; grow
        # sk (the output lane dim -> store-stream width) before sq.
        s_pad = pad128(S)
        sk = next((c for c in (1024, 512, 256, 128)
                   if s_pad % c == 0 and fits(1, 1, 128, c)), 128)
        sq = next((c for c in (512, 256, 128)
                   if s_pad % c == 0 and fits(1, 1, c, sk)), 128)

    # Grow the head block, then the batch block, while the budget holds.
    hb = next(h for h in range(H, 0, -1) if H % h == 0 and fits(1, h, sq, sk))
    bb = next(b for b in range(B, 0, -1) if B % b == 0 and fits(b, hb, sq, sk))

    # Guarantee >= 2 grid steps along some parallel axis so both v7x
    # TensorCores get work even when everything fits in a single block.
    if (s_pad // sq) * (s_pad // sk) * (H // hb) * (B // bb) == 1:
        if B > 1:
            bb = next(b for b in range(B // 2, 0, -1) if B % b == 0)
        elif H > 1:
            hb = next(h for h in range(H // 2, 0, -1) if H % h == 0)
        elif sq % 16 == 0:
            sq //= 2
    return s_pad, sq, sk, hb, bb


def prepare_relative_bias(relative_bias):
    """Hoisted out of the per-call path: permute the (max_len, max_len, H)
    parameter once to (H, max_len, max_len)."""
    return jnp.transpose(relative_bias, (2, 0, 1))


def rpe_attention_scores(query, key, bias_hmm):
    """query, key: (B, S, H, D); bias_hmm: (H, max_len, max_len) pre-permuted.

    Returns attention scores (B, H, S, S) = QK^T + relative bias, matching the
    PyTorch module's forward output.
    """
    B, S, H, D = query.shape
    max_len = bias_hmm.shape[1]
    assert S <= max_len, "sequence length exceeds max_len"

    vmem_limit = _vmem_limit_bytes()
    s_pad, sq, sk, hb, bb = _choose_tiles(
        B, H, S, D, budget_bytes=vmem_limit - 2 * 1024 * 1024)

    # Layout plumbing (outside the kernel): q -> (B, H, S, D), k -> (B, H, D, S)
    # so the dot is the MXU-native NN form and the k block has no D lane-pad.
    q_in = jnp.transpose(query, (0, 2, 1, 3))
    k_in = jnp.transpose(key, (0, 2, 3, 1))
    if s_pad != S:
        q_in = jnp.pad(q_in, ((0, 0), (0, 0), (0, s_pad - S), (0, 0)))
        k_in = jnp.pad(k_in, ((0, 0), (0, 0), (0, 0), (0, s_pad - S)))

    # Bias: when the tile shapes satisfy the (8, 128) rule on their own, index
    # straight into the top-left corner of the full parameter (no per-call
    # slice/copy); otherwise materialize the (H, s_pad, s_pad) window.
    whole_s = (s_pad == sq) and (s_pad == sk)
    corner_ok = s_pad <= max_len and (
        (sq % 8 == 0 and sk % 128 == 0) or (whole_s and s_pad == max_len))
    if corner_ok:
        bias_in = bias_hmm
    else:
        bias_in = bias_hmm[:, :S, :S]
        if s_pad != S:
            bias_in = jnp.pad(bias_in, ((0, 0), (0, s_pad - S), (0, s_pad - S)))

    grid = (s_pad // sq, s_pad // sk, H // hb, B // bb)

    cost = pl.CostEstimate(
        flops=2 * B * H * s_pad * s_pad * D,
        transcendentals=0,
        bytes_accessed=4 * (B * H * s_pad * s_pad        # scores written
                            + 2 * B * H * s_pad * D      # q + k read
                            + H * s_pad * s_pad))        # bias read once

    out = pl.pallas_call(
        _rpe_kernel,
        out_shape=jax.ShapeDtypeStruct((B, H, s_pad, s_pad), jnp.float32),
        grid_spec=pltpu.PrefetchScalarGridSpec(
            num_scalar_prefetch=0,
            grid=grid,
            # Batch innermost: the bias block index is constant along it, so
            # Pallas skips re-DMAing the bias tile across batch blocks.
            in_specs=[
                pl.BlockSpec((bb, hb, sq, D), lambda qi, ki, hi, bi: (bi, hi, qi, 0)),
                pl.BlockSpec((bb, hb, D, sk), lambda qi, ki, hi, bi: (bi, hi, 0, ki)),
                pl.BlockSpec((hb, sq, sk),    lambda qi, ki, hi, bi: (hi, qi, ki)),
            ],
            out_specs=pl.BlockSpec((bb, hb, sq, sk),
                                   lambda qi, ki, hi, bi: (bi, hi, qi, ki)),
        ),
        compiler_params=pltpu.CompilerParams(
            # No carried state: every step writes a disjoint output slab, so
            # every axis may be sharded across v7x's two TensorCores.
            dimension_semantics=("parallel", "parallel", "parallel", "parallel"),
            vmem_limit_bytes=vmem_limit,
        ),
        cost_estimate=cost,
    )(q_in, k_in, bias_in)

    if s_pad != S:
        out = out[:, :, :S, :S]
    return out


def make_sinusoidal_embeddings(max_len, dim):
    """Mirror of _generate_sinusoidal_embeddings (plain JAX glue; dead w.r.t.
    the returned attention scores, kept for module fidelity)."""
    position = jnp.arange(max_len, dtype=jnp.float32)[:, None]
    div_term = jnp.exp(jnp.arange(0, dim, 2, dtype=jnp.float32)
                       * -(math.log(10000.0) / dim))
    emb = jnp.zeros((max_len, dim), dtype=jnp.float32)
    emb = emb.at[:, 0::2].set(jnp.sin(position * div_term))
    emb = emb.at[:, 1::2].set(jnp.cos(position * div_term))
    return emb


def init_relative_bias(key, max_len, num_heads):
    """Deterministic xavier_uniform-style init for (max_len, max_len, H)."""
    fan_in = max_len * num_heads
    fan_out = max_len * num_heads
    bound = math.sqrt(6.0 / (fan_in + fan_out))
    return jax.random.uniform(key, (max_len, max_len, num_heads),
                              dtype=jnp.float32, minval=-bound, maxval=bound)


if __name__ == "__main__":
    # Small shapes consistent with the module: d_model=32, num_heads=4 -> head_dim=8
    B, S, H, D = 2, 8, 4, 8
    max_len = 64

    root = jax.random.PRNGKey(0)
    k_q, k_k, k_b = jax.random.split(root, 3)
    query = jax.random.normal(k_q, (B, S, H, D), dtype=jnp.float32)
    key = jax.random.normal(k_k, (B, S, H, D), dtype=jnp.float32)
    relative_bias = init_relative_bias(k_b, max_len, H)
    bias_hmm = prepare_relative_bias(relative_bias)   # parameter permute, hoisted once
    freqs = make_sinusoidal_embeddings(max_len, D)    # module parity; unused by output

    out = jax.block_until_ready(rpe_attention_scores(query, key, bias_hmm))

    # Reference check against plain-JAX semantics of the PyTorch forward.
    ref = jnp.einsum('bqhd,bkhd->bhqk', query, key)
    ref = ref + jnp.transpose(relative_bias[:S, :S, :], (2, 0, 1))[None]
    assert out.shape == (B, H, S, S)
    assert jnp.allclose(out, ref, atol=1e-5, rtol=1e-5), "mismatch vs reference"

    print("KERNEL_OK")
</pallas_src>

<mosaic_0001>
module attributes {stable_mosaic.version = 11 : i64} {
  func.func @_rpe_kernel(%arg0: i32, %arg1: i32, %arg2: i32, %arg3: i32, %arg4: memref<1x4x8x8xf32, #tpu.memory_space<vmem>>, %arg5: memref<1x4x8x8xf32, #tpu.memory_space<vmem>>, %arg6: memref<4x8x8xf32, #tpu.memory_space<vmem>>, %arg7: memref<1x4x8x8xf32, #tpu.memory_space<vmem>>) attributes {dimension_semantics = [#tpu.dimension_semantics<parallel>, #tpu.dimension_semantics<parallel>, #tpu.dimension_semantics<parallel>, #tpu.dimension_semantics<parallel>], iteration_bounds = array<i64: 1, 1, 1, 2>, scalar_prefetch = 0 : i64, scratch_operands = 0 : i64, tpu.core_type = #tpu.core_type<tc>, window_params = [{transform_indices = @transform_0, window_bounds = array<i64: 1, 4, 8, 8>}, {transform_indices = @transform_1, window_bounds = array<i64: 1, 4, 8, 8>}, {transform_indices = @transform_2, window_bounds = array<i64: 4, 8, 8>}, {transform_indices = @transform_3, window_bounds = array<i64: 1, 4, 8, 8>}]} {
    %c0 = arith.constant 0 : index
    %c0_0 = arith.constant 0 : index
    %c0_1 = arith.constant 0 : index
    %c0_2 = arith.constant 0 : index
    %0 = vector.load %arg4[%c0, %c0_0, %c0_1, %c0_2] : memref<1x4x8x8xf32, #tpu.memory_space<vmem>>, vector<1x4x8x8xf32>
    %1 = vector.shape_cast %0 : vector<1x4x8x8xf32> to vector<4x8x8xf32>
    %c0_3 = arith.constant 0 : index
    %c0_4 = arith.constant 0 : index
    %c0_5 = arith.constant 0 : index
    %c0_6 = arith.constant 0 : index
    %2 = vector.load %arg5[%c0_3, %c0_4, %c0_5, %c0_6] : memref<1x4x8x8xf32, #tpu.memory_space<vmem>>, vector<1x4x8x8xf32>
    %3 = vector.shape_cast %2 : vector<1x4x8x8xf32> to vector<4x8x8xf32>
    %cst = arith.constant dense<0.000000e+00> : vector<4x8x8xf32>
    %4 = tpu.matmul %1, %3, %cst {dimension_numbers = #tpu.dot_dimension_numbers<[2], [1], [1], [2], [0, 0, 0, 1, 1, 2], [0], [0]>} : vector<4x8x8xf32>, vector<4x8x8xf32>, vector<4x8x8xf32> -> vector<4x8x8xf32>
    %5 = vector.shape_cast %4 : vector<4x8x8xf32> to vector<1x4x8x8xf32>
    %c0_7 = arith.constant 0 : index
    %c0_8 = arith.constant 0 : index
    %c0_9 = arith.constant 0 : index
    %6 = vector.load %arg6[%c0_7, %c0_8, %c0_9] : memref<4x8x8xf32, #tpu.memory_space<vmem>>, vector<4x8x8xf32>
    %7 = vector.shape_cast %6 : vector<4x8x8xf32> to vector<1x4x8x8xf32>
    %8 = arith.addf %5, %7 : vector<1x4x8x8xf32>
    %c0_10 = arith.constant 0 : index
    %c0_11 = arith.constant 0 : index
    %c0_12 = arith.constant 0 : index
    %c0_13 = arith.constant 0 : index
    %9 = vector.load %arg7[%c0_10, %c0_11, %c0_12, %c0_13] : memref<1x4x8x8xf32, #tpu.memory_space<vmem>>, vector<1x4x8x8xf32>
    tpu.vector_store %arg7[%c0_10, %c0_11, %c0_12, %c0_13], %8 {strides = array<i32>} : memref<1x4x8x8xf32, #tpu.memory_space<vmem>>, vector<1x4x8x8xf32>,
    return
  }
  func.func @transform_0(%arg0: i32, %arg1: i32, %arg2: i32, %arg3: i32) -> (i32, i32, i32, i32) {
    %c0_i32 = arith.constant 0 : i32
    %c0_i32_0 = arith.constant 0 : i32
    return %arg3, %arg2, %arg0, %c0_i32 : i32, i32, i32, i32
  }
  func.func @transform_1(%arg0: i32, %arg1: i32, %arg2: i32, %arg3: i32) -> (i32, i32, i32, i32) {
    %c0_i32 = arith.constant 0 : i32
    %c0_i32_0 = arith.constant 0 : i32
    return %arg3, %arg2, %c0_i32, %arg1 : i32, i32, i32, i32
  }
  func.func @transform_2(%arg0: i32, %arg1: i32, %arg2: i32, %arg3: i32) -> (i32, i32, i32) {
    %c0_i32 = arith.constant 0 : i32
    return %arg2, %arg0, %arg1 : i32, i32, i32
  }
  func.func @transform_3(%arg0: i32, %arg1: i32, %arg2: i32, %arg3: i32) -> (i32, i32, i32, i32) {
    %c0_i32 = arith.constant 0 : i32
    return %arg3, %arg2, %arg0, %arg1 : i32, i32, i32, i32
  }
}

</mosaic_0001>

<bundles_post_ra>
// kernel: tpu_custom_call.1
= control target key start
LH: loop header
LB: loop body
LE: loop exit
PB: predicated region body
PF: predicated region fallthrough
CT: control target
= control target key end

     0   :  { %s1408_s0 = inlined_call_operand.hbm [shape: f32[2,4,8,8], index: 0, kind: input, shape index: {}]   ;;  %s1409_s1 = inlined_call_operand.hbm [shape: f32[2,4,8,8], index: 1, kind: input, shape index: {}]   ;;  %s1410_s2 = inlined_call_operand.hbm [shape: f32[4,8,8], index: 2, kind: input, shape index: {}]   ;;  %s1411_s3 = inlined_call_operand.hbm [shape: f32[2,4,8,8], index: 3, kind: output, shape index: {}]  }
   0x1   :  { %1419 = sst [smem:[#allocation13_spill]] %s1408_s0 }
   0x2   :  { %1420 = sst [smem:[#allocation14_spill]] %s1410_s2 }
   0x3   :  { %8 = vsyncpa [#allocation3], 0 }
   0x4   :  { %10 = vsyncpa [#allocation3 + $0x1], 0 }
   0x5   :  { %11 = vsyncpa [#allocation6], 0 }
   0x6   :  { %13 = vsyncpa [#allocation6 + $0x1], 0 }
   0x7   :  { %14 = vsyncpa [#allocation4], 0 }
   0x8   :  { %16 = vsyncpa [#allocation4 + $0x1], 0  ;;  %s1125_s12 = smov 0   ;;  %s1127_s13 = smov 0  }
   0x9   :  { %s1129_s14 = smov 0   ;;  %s1131_s15 = smov 0  }
   0xa   :  { %s1133_s16 = smov 0   ;;  %s1135_s17 = smov 0  }
   0xb LB: > { %s1156_s18 = sadd.s32 4294967295, %s1093_s17   ;;  %s776_s19 = sadd.s32 4294967294, %s1093_s17   ;;  %s1093_s17 = sphi %s1135_s17, %s22_s17   ;;  %s1089_s16 = sphi %s1133_s16, %s1443_s16   ;;  %s1085_s15 = sphi %s1131_s15, %s1442_s15   ;;  %s1081_s14 = sphi %s1129_s14, %s1441_s14   ;;  %s1077_s13 = sphi %s1127_s13, %s1440_s13   ;;  %s1073_s12 = sphi %s1125_s12, %s1439_s12  }
   0xc   : > { %p72_p0 = scmp.ne.s32.totalorder %s1077_s13, %s1073_s12  ;;  %p1412_p1 = scmp.eq.s32.totalorder %s1156_s18, 0 }
   0xd   : > { %p168_p3 = scmp.eq.s32.totalorder %s776_s19, 1  ;;  %p777_p5 = scmp.ge.s32.totalorder %s1093_s17, 1 }
   0xe   : > { %p1165_p4 = por %p1412_p1, %p72_p0  ;;  %p175_p7 = scmp.lt.s32.totalorder %s1093_s17, 3 }
   0xf   : > { %p1170_p6 = por %p168_p3, %p72_p0  ;;  %s1095_s23 = smov [#allocation7]  }
  0x10   : > { %s1421_s20 = scalar_select %p1165_p4, 1, 0 }
  0x11   : > { %s1422_s21 = scalar_select %p1170_p6, 1, 0 }
  0x12   : > { %p1175_p8 = pnand %p777_p5, %p175_p7  ;;  %s192_s24 = sshll.u32 %s1095_s23, 4  ;;  %s193_s24 = int_to_ptr.vmem [resolvable:$true] %s192_s24 }
  0x13   : > { %s37_s26 = sadd.s32 1, %s1089_s16  ;;  %s1425_s2 = sld [smem:[#allocation14_spill]] }
  0x14   : > { %s1423_s22 = scalar_select %p1175_p8, 1, 0 }
  0x15   : > { %p841_p9 = pneg %p1175_p8 }
  0x17   : > { %p1184_p11 = pnand %p841_p9, %p1412_p1 }
  0x19   : > { %s915_s29 = scalar_lea.hbm %s1425_s2, 512  ;;  %p917_p13 = pneg %p1184_p11 }
  0x1a   : > { %p916_p12 = scmp.ne.s32.totalorder %s1425_s2, %s915_s29  ;;  %p922_p5 = scmp.lt.u32.totalorder %s915_s29, %s1425_s2 }
  0x1c   : > { %p918_p0 = pnand %p917_p13, %p916_p12 }
  0x1e   : > { %p919_p3 = pneg %p918_p0 }
  0x20   : > { %p924_p7 = pnand %p922_p5, %p919_p3 }
  0x22   : > { %927 = shalt.err (!%p924_p7)
}
  0x23   : > { %s928_s7 = scalar_lea.vmem %s193_s24, 512  ;;  %p936_p2 = scmp.lt.s32.totalorder %s193_s24, %s193_s24 }
  0x24   : > { %p929_p9 = scmp.ne.s32.totalorder %s193_s24, %s928_s7  ;;  %p937_p6 = scmp.lt.s32.totalorder %s928_s7, %s928_s7 }
  0x26   : > { %p931_p10 = pnand %p929_p9, %p917_p13  ;;  %p938_p4 = por %p937_p6, %p936_p2 }
  0x28   : > { %p932_p1 = pneg %p931_p10 }
  0x2a   : > { %p939_p8 = pnand %p938_p4, %p932_p1 }
  0x2c   : > { %942 = shalt.err (!%p939_p8)
}
  0x2d   : > { %s1415_s8 = smov 128   ;;  %s1417_s9 = smov 8  }
  0x2e   : > { %844 = dma.hbm_to_vmem [thread:$0]  (!%p1184_p11), %s1425_s2, 512, %s193_s24, [#allocation6], %s1415_s8, %s1415_s8, %s1417_s9  }
  0x2f   : > { %p38_p1 = scmp.ge.s32.totalorder %s37_s26, 2  ;;  %s59_s19 = sadd.s32 1, %s1081_s14 }
  0x30   : > { %p66_p2 = scmp.ne.s32.totalorder %s1081_s14, %s1077_s13  ;;  %p67_p4 = scmp.eq.s32.totalorder %s1093_s17, 0 }
  0x31   : > { %s1445_s26 = smov (%p38_p1, %s37_s26), 0  ;;  %p1427_p8 = scmp.eq.s32.totalorder %s1156_s18, 1 }
  0x32   : > { %p1214_p6 = por %p67_p4, %p66_p2  ;;  %s52_s27 = ssub.s32 %s1089_s16, %s1445_s26 }
  0x33   : > { %p1220_p10 = por %p1427_p8, %p66_p2  ;;  %p857_p12 = scmp.lt.s32.totalorder %s1093_s17, 2 }
  0x34   : > { %p57_p11 = scmp.eq.s32.totalorder %s52_s27, 0  ;;  %s206_s24 = sand.u32 1, %s1081_s14  }
  0x35   : > { %s780_s28 = sshll.u32 %s206_s24, 5  ;;  %s800_s30 = sshll.u32 %s1089_s16, 9 }
  0x36   : > { %s1229_s29 = scalar_select %p57_p11, %s1081_s14, %s59_s19  }
  0x37   : > { %s1429_s0 = sld [smem:[#allocation13_spill]]  ;;  %s210_s7 = scalar_lea.vmem [#allocation2], %s780_s28 }
  0x38   : > { %s220_s10 = sshll.u32 %s210_s7, 4  ;;  %p1241_p13 = pnand %p857_p12, %p1214_p6  ;;  %s1237_s10 = int_to_ptr.vmem [resolvable:$true] %s220_s10 }
  0x39   : > { %s1248_s4 = scalar_lea.hbm %s1409_s1, %s800_s30  ;;  %s234_s5 = scalar_lea.vmem [#allocation5], %s780_s28 }
  0x3a   : > { %s1250_s8 = sshll.u32 %s234_s5, 4  ;;  %s1252_s9 = scalar_lea.sflag [#allocation3], %s206_s24  ;;  %s1284_s8 = int_to_ptr.vmem [resolvable:$true] %s1250_s8 }
  0x3b   : > { %p945_p3 = pneg %p1241_p13 }
  0x3d   : > { %s1235_s6 = scalar_lea.hbm %s1429_s0, %s800_s30  ;;  %s948_s19 = scalar_lea.hbm %s1429_s0, 1024 }
  0x3e   : > { %s943_s7 = scalar_lea.hbm %s1235_s6, 512  ;;  %p949_p9 = scmp.lt.u32.totalorder %s1235_s6, %s1429_s0 }
  0x3f   : > { %p944_p0 = scmp.ne.s32.totalorder %s1235_s6, %s943_s7  ;;  %p950_p1 = scmp.lt.u32.totalorder %s948_s19, %s943_s7 }
  0x40   : > { %p952_p4 = scmp.lt.u32.totalorder %s943_s7, %s1235_s6 }
  0x41   : > { %p946_p5 = pnand %p945_p3, %p944_p0  ;;  %p951_p2 = por %p950_p1, %p949_p9 }
  0x43   : > { %p947_p7 = pneg %p946_p5  ;;  %p953_p6 = por %p952_p4, %p951_p2 }
  0x45   : > { %p954_p8 = pnand %p953_p6, %p947_p7 }
  0x47   : > { %957 = shalt.err (!%p954_p8)
}
  0x48   : > { %s958_s24 = scalar_lea.vmem %s1237_s10, 512  ;;  %s1098_s2 = smov [#allocation2]  }
  0x49   : > { %p959_p12 = scmp.ne.s32.totalorder %s1237_s10, %s958_s24  ;;  %s963_s28 = sshll.u32 %s1098_s2, 4  ;;  %s964_s28 = int_to_ptr.vmem [resolvable:$false] %s963_s28 }
  0x4a   : > { %s965_s5 = scalar_lea.vmem %s964_s28, 1024  ;;  %p966_p5 = scmp.lt.s32.totalorder %s1237_s10, %s964_s28 }
  0x4b   : > { %p961_p11 = pnand %p959_p12, %p945_p3  ;;  %p967_p9 = scmp.lt.s32.totalorder %s965_s5, %s958_s24 }
  0x4d   : > { %p962_p0 = pneg %p961_p11  ;;  %p968_p1 = por %p967_p9, %p966_p5 }
  0x4f   : > { %p969_p2 = pnand %p968_p1, %p962_p0 }
  0x51   : > { %972 = shalt.err (!%p969_p2)
}
  0x52   : > { %s1431_s7 = smov 8   ;;  %s1432_s23 = smov 128  }
  0x53   : > { %848 = dma.hbm_to_vmem [thread:$0]  (!%p1241_p13), %s1235_s6, 512, %s1237_s10, %s1252_s9, %s1432_s23, %s1432_s23, %s1431_s7  }
  0x54   : > { %s230_s19 = sand.u32 1, %s1093_s17   ;;  %s973_s30 = scalar_lea.hbm %s1248_s4, 512 }
  0x55   : > { %s1287_s27 = scalar_lea.sflag [#allocation6], %s230_s19  ;;  %p974_p7 = scmp.ne.s32.totalorder %s1248_s4, %s973_s30 }
  0x56   : > { %s978_s28 = scalar_lea.hbm %s1409_s1, 1024  ;;  %p979_p8 = scmp.lt.u32.totalorder %s1248_s4, %s1409_s1 }
  0x57   : > { %p976_p4 = pnand %p974_p7, %p945_p3  ;;  %p980_p12 = scmp.lt.u32.totalorder %s978_s28, %s973_s30 }
  0x58   : > { %p982_p0 = scmp.lt.u32.totalorder %s973_s30, %s1248_s4 }
  0x59   : > { %p977_p6 = pneg %p976_p4  ;;  %p981_p11 = por %p980_p12, %p979_p8 }
  0x5b   : > { %p983_p5 = por %p982_p0, %p981_p11 }
  0x5d   : > { %p984_p9 = pnand %p983_p5, %p977_p6 }
  0x5f   : > { %987 = shalt.err (!%p984_p9)
}
  0x60   : > { %s988_s9 = scalar_lea.vmem %s1284_s8, 512  ;;  %s1099_s6 = smov [#allocation5]  }
  0x61   : > { %p989_p1 = scmp.ne.s32.totalorder %s1284_s8, %s988_s9  ;;  %s993_s10 = sshll.u32 %s1099_s6, 4  ;;  %s994_s10 = int_to_ptr.vmem [resolvable:$false] %s993_s10 }
  0x62   : > { %s995_s0 = scalar_lea.vmem %s994_s10, 1024  ;;  %p996_p4 = scmp.lt.s32.totalorder %s1284_s8, %s994_s10 }
  0x63   : > { %p991_p2 = pnand %p989_p1, %p945_p3  ;;  %p997_p8 = scmp.lt.s32.totalorder %s995_s0, %s988_s9 }
  0x65   : > { %p992_p7 = pneg %p991_p2  ;;  %p998_p12 = por %p997_p8, %p996_p4 }
  0x67   : > { %p999_p11 = pnand %p998_p12, %p992_p7 }
  0x69   : > { %1002 = shalt.err (!%p999_p11)
}
  0x6a   : > { %851 = dma.hbm_to_vmem [thread:$0]  (!%p1241_p13), %s1248_s4, 512, %s1284_s8, %s1287_s27, %s1432_s23, %s1432_s23, %s1431_s7  }
  0x6b   : > { %p1433_p3 = scmp.ne.s32.totalorder %s1423_s22, 0 }
  0x6c   : > { %s1319_s19 = sand.u32 (!%p1433_p3), 1, %s1077_s13   ;;  %p1434_p6 = scmp.ne.s32.totalorder (!%p1433_p3), %s1421_s20, 0 }
  0x6d   : > { %256 = sbr.rel (%p1433_p3) target bundleno = 360 (0x168), region = 32  ;;  %s1322_s30 = sshll.u32 (!%p1433_p3), %s1319_s19, 5 }
  0x6e   : > { %s259_s11 = scalar_lea.sflag (!%p1433_p3), [#allocation3], %s1319_s19  ;;  %s262_s24 = scalar_lea.vmem (!%p1433_p3), [#allocation2], %s1322_s30 }
  0x74   : > { %1056 = dma.done.wait (%p1434_p6), %s259_s11, 512  }
  0x75   : > { %1058 = vsyncadd (%p1434_p6), %s259_s11, 4294966784  ;;  %s267_s22 = sand.u32 1, %s1156_s18   ;;  %s271_s4 = scalar_lea.vmem [#allocation5], %s1322_s30 }
  0x76   : > { %s268_s8 = scalar_lea.sflag [#allocation6], %s267_s22 }
  0x77   : > { %1060 = dma.done.wait (%p1434_p6), %s268_s8, 512  }
  0x78   : > { %1062 = vsyncadd (%p1434_p6), %s268_s8, 4294966784  ;;  %p1435_p13 = scmp.eq.s32.totalorder %s1156_s18, 0 }
  0x7a   : > { %1064 = dma.done.wait (%p1435_p13), [#allocation6], 512   ;;  %p1436_p0 = pmov %p1435_p13 }
  0x7b   : > { %v1100_v0 = vmov 0.0   ;;  %vm1101_vm0 = vmmov 0   ;;  %vm315_vm1 = vcmask 64512   ;;  %v311_v1 = vld [vmem:[%s271_s4] sm:$0xff]  ;;  %v312_v2 = vld [vmem:[%s271_s4 + $0x8] sm:$0xff]  ;;  %v313_v5 = vld [vmem:[%s271_s4 + $0x10] sm:$0xff] }
  0x7c   : > { %1066 = vsyncadd (%p1436_p0), [#allocation6], 4294966784  ;;  %811 = vmatprep.subr.mxu0 %v1100_v0  ;;  %816 = vmatprep.subr.mxu1 %v1100_v0  ;;  %v307_v3 = vld [vmem:[%s262_s24] sm:$0xff]  ;;  %v308_v4 = vld [vmem:[%s262_s24 + $0x8] sm:$0xff]  ;;  %s302_s18 = scalar_lea.vmem [#allocation8], %s1322_s30  ;;  %s802_s7 = sshll.u32 %s1085_s15, 9 }
  0x7d   : > { %813 = vmatprep.mubr.msk.f32.mxu0 %vm1101_vm0, %v1100_v0  ;;  %818 = vmatprep.mubr.msk.f32.mxu1 %vm1101_vm0, %v1100_v0  ;;  %v314_v6 = vld [vmem:[%s271_s4 + $0x18] sm:$0xff]  ;;  %v309_v7 = vld [vmem:[%s262_s24 + $0x10] sm:$0xff]  ;;  %v608_v9 = vld [vmem:[#allocation7] sm:$0xff]  ;;  %s638_s20 = sshll.u32 %s302_s18, 4  ;;  %s1357_s2 = scalar_lea.hbm %s1411_s3, %s802_s7  ;;  %s1351_s20 = int_to_ptr.vmem [resolvable:$true] %s638_s20 }
  0x7e   : > { %812 = vmatpush3.msra.mxu0 %v311_v1  ;;  %817 = vmatpush3.msra.mxu1 %v312_v2  ;;  %v310_v8 = vld [vmem:[%s262_s24 + $0x18] sm:$0xff]  ;;  %v609_v10 = vld [vmem:[#allocation7 + $0x8] sm:$0xff]  ;;  %v610_v17 = vld [vmem:[#allocation7 + $0x10] sm:$0xff]  ;;  %s621_s15 = scalar_lea.sflag [#allocation4], %s1319_s19  ;;  %s1003_s28 = scalar_lea.vmem %s1351_s20, 512 }
  0x7f   : > { %814 = vmatmul.mubr.msk.f32.vlgmr.msra.gmra.mrb[0].mxu0 %vm315_vm1, %v307_v3  ;;  %819 = vmatmul.mubr.msk.f32.vlgmr.msra.gmra.mrb[0].mxu1 %vm315_vm1, %v308_v4  ;;  %v611_v18 = vld [vmem:[#allocation7 + $0x18] sm:$0xff]  ;;  %p1004_p5 = scmp.ne.s32.totalorder %s1351_s20, %s1003_s28  ;;  %s1102_s5 = smov [#allocation8]  }
  0x80   : > { %821 = vmatprep.subr.mxu0 %v1100_v0  ;;  %826 = vmatprep.subr.mxu1 %v1100_v0  ;;  %s1007_s9 = sshll.u32 %s1102_s5, 4  ;;  %s1008_s9 = int_to_ptr.vmem [resolvable:$false] %s1007_s9 }
  0x81   : > { %822 = vmatpush3.msra.mxu0 %v313_v5  ;;  %827 = vmatpush3.msra.mxu1 %v314_v6  ;;  %p1005_p9 = pnand %p1004_p5, %p1220_p10  ;;  %s1009_s6 = scalar_lea.vmem %s1008_s9, 1024 }
  0x82   : > { %823 = vmatprep.mubr.msk.f32.mxu0 %vm1101_vm0, %v1100_v0  ;;  %828 = vmatprep.mubr.msk.f32.mxu1 %vm1101_vm0, %v1100_v0  ;;  %p1010_p2 = scmp.lt.s32.totalorder %s1351_s20, %s1008_s9  ;;  %p1011_p7 = scmp.lt.s32.totalorder %s1009_s6, %s1003_s28 }
  0x83   : > { %824 = vmatmul.mubr.msk.f32.vlgmr.msra.gmra.mrb[2].mxu0 %vm315_vm1, %v309_v7  ;;  %829 = vmatmul.mubr.msk.f32.vlgmr.msra.gmra.mrb[2].mxu1 %vm315_vm1, %v310_v8  ;;  %p1006_p1 = pneg %p1005_p9 }
  0x84   : > { %p1012_p4 = por %p1011_p7, %p1010_p2 }
  0x86   : > { %p1013_p8 = pnand %p1012_p4, %p1006_p1 }
 0x152   : > { %v385_v11 = vpop.f32.mrb[0].mxu0  ;;  %v458_v12 = vpop.f32.mrb[0].mxu1 }
 0x153   : > { %v612_v13 = vadd.f32 %v608_v9, %v385_v11  ;;  %v613_v14 = vadd.f32 %v609_v10, %v458_v12  ;;  %v815_v15 = vpop.f32.mrb[1].mxu0  ;;  %v820_v16 = vpop.f32.mrb[1].mxu1 }
 0x155   : > { %616 = vst.msk [vmem:[%s302_s18] sm:$0xff] %vm315_vm1, %v612_v13  ;;  %617 = vst.msk [vmem:[%s302_s18 + $0x8] sm:$0xff] %vm315_vm1, %v613_v14 }
 0x156   : > { %v531_v19 = vpop.f32.mrb[2].mxu0  ;;  %v604_v20 = vpop.f32.mrb[2].mxu1 }
 0x157   : > { %v614_v21 = vadd.f32 %v610_v17, %v531_v19  ;;  %v615_v22 = vadd.f32 %v611_v18, %v604_v20  ;;  %v825_v23 = vpop.f32.mrb[3].mxu0  ;;  %v830_v24 = vpop.f32.mrb[3].mxu1 }
 0x159   : > { %618 = vst.msk [vmem:[%s302_s18 + $0x10] sm:$0xff] %vm315_vm1, %v614_v21  ;;  %619 = vst.msk [vmem:[%s302_s18 + $0x18] sm:$0xff] %vm315_vm1, %v615_v22 }
 0x15a   : > { %1016 = shalt.err (!%p1013_p8)
}
 0x15b   : > { %s1017_s10 = scalar_lea.hbm %s1357_s2, 512  ;;  %s1021_s11 = scalar_lea.hbm %s1411_s3, 1024 }
 0x15c   : > { %p1018_p12 = scmp.ne.s32.totalorder %s1357_s2, %s1017_s10  ;;  %p1022_p6 = scmp.lt.u32.totalorder %s1357_s2, %s1411_s3 }
 0x15d   : > { %p1023_p13 = scmp.lt.u32.totalorder %s1021_s11, %s1017_s10  ;;  %p1025_p5 = scmp.lt.u32.totalorder %s1017_s10, %s1357_s2 }
 0x15e   : > { %p1019_p11 = pnand %p1018_p12, %p1220_p10 }
 0x15f   : > { %p1024_p0 = por %p1023_p13, %p1022_p6 }
 0x160   : > { %p1020_p3 = pneg %p1019_p11 }
 0x161   : > { %p1026_p9 = por %p1025_p5, %p1024_p0 }
 0x163   : > { %p1027_p1 = pnand %p1026_p9, %p1020_p3 }
 0x165   : > { %1030 = shalt.err (!%p1027_p1)
}
 0x166   : > { %s1103_s8 = smov 128   ;;  %s1104_s4 = smov 8  }
 0x167   : > { %839 = dma.vmem_to_hbm [thread:$0]  (%p1220_p10), %s1351_s20, 512, %s1357_s2, %s621_s15, %s1103_s8, %s1103_s8, %s1104_s4  }
 0x168 PF: > { %s653_s18 = sand.u32 1, %s1073_s12   ;;  %p1437_p2 = scmp.ne.s32.totalorder %s1422_s21, 0 }
 0x169   : > { %p1438_p7 = scmp.ge.s32.totalorder %s1093_s17, 2  ;;  %s654_s7 = scalar_lea.sflag [#allocation4], %s653_s18 }
 0x16b   : > { %p853_p4 = pnand %p1438_p7, %p1437_p2 }
 0x16d   : > { %1068 = dma.done.wait (!%p853_p4), %s654_s7, 512  }
 0x16e   : > { %1070 = vsyncadd (!%p853_p4), %s654_s7, 4294966784  ;;  %s22_s17 = sadd.s32 1, %s1093_s17   ;;  %s1439_s12 = smov %s1077_s13 }
 0x16f   : > { %p19_p8 = scmp.ge.s32.totalorder %s22_s17, 4   ;;  %s1440_s13 = smov %s1081_s14 }
 0x170   : > { %s1441_s14 = smov %s1229_s29  ;;  %s1442_s15 = smov %s1089_s16 }
 0x171   : > { %s1443_s16 = smov %s1445_s26  ;;  %21 = sbr.rel (!%p19_p8) target bundleno = 11 (0xb), region = 95 }
 0x178   :  { %659 = vsyncpa [#allocation3], 1 }
 0x179   :  { %661 = vsyncpa [#allocation3 + $0x1], 1 }
 0x17a   :  { %662 = vsyncpa [#allocation6], 1 }
 0x17b   :  { %664 = vsyncpa [#allocation6 + $0x1], 1 }
 0x17c   :  { %665 = vsyncpa [#allocation4], 1 }
 0x17d   :  { %667 = vsyncpa [#allocation4 + $0x1], 1 }

</bundles_post_ra>
